<compile_context>
chip_gen: v6e
topology: v6e:2x2x1
jax: 0.10.0
libtpu: 0.0.40
codegen_flags: <defaults>
</compile_context>

<pallas_src>
import math
import functools

import jax
import jax.numpy as jnp
from jax import lax
from jax.experimental import pallas as pl
from jax.experimental.pallas import tpu as pltpu


def _cdiv(a, b):
    return -(-a // b)


def _eca_kernel_size(in_channels: int) -> int:
    # Mirrors EcaBlock.__init__
    k = int(abs((math.log(in_channels, 2) + 2) / 2))
    return k if k % 2 else k + 1


def _channel_conv_sigmoid(pooled, w_ref, bn_ref, K, PAD):
    """pooled: (Bt, Cp) f32 with channels on lanes.  Returns sigmoid(BN(conv1d(pooled)))."""
    Bt, Cp = pooled.shape
    padded = jnp.pad(pooled, ((0, 0), (PAD, PAD)))           # conv zero padding
    conv = jnp.zeros((Bt, Cp), jnp.float32)
    for j in range(K):                                       # K tiny & static
        conv = conv + w_ref[j] * lax.slice(padded, (0, j), (Bt, j + Cp))
    return jax.nn.sigmoid(conv * bn_ref[0] + bn_ref[1])


def _eca_fused_kernel(x_ref, w_ref, bn_ref, o_ref, *, K, PAD, HW):
    # x_ref / o_ref: (Bt, C, HW) blocks in the input dtype (possibly a partial
    # batch block: OOB rows stay confined and their stores are masked).
    # w_ref: (K,) SMEM f32 conv taps; bn_ref: (2,) SMEM f32 [scale, shift].
    inv_hw = 1.0 / HW
    # One f32 pooled reduction for the whole block (no per-batch unroll, no
    # full-tile f32 copy).
    pooled = jnp.sum(x_ref[...], axis=2, dtype=jnp.float32) * inv_hw      # (Bt, C)
    attn = _channel_conv_sigmoid(pooled, w_ref, bn_ref, K, PAD)           # (Bt, C)
    # TODO(synk): attn is cast to the input dtype before the gate multiply; for
    # sub-f32 inputs this quantizes the gate slightly vs a full-f32 product.
    o_ref[...] = attn.astype(o_ref.dtype)[..., None] * x_ref[...]


def _eca_tiled_kernel(x_ref, w_ref, bn_ref, o_ref, pooled_sc, attn_sc, *,
                      K, PAD, HW, C, Ct, C_blocks):
    # Grid: (batch, phase, channel tile).  Phase 0 pools each (1, Ct, HW) tile
    # into pooled_sc; phase 1 (at tile 0) runs the channel conv on the full
    # pooled vector, then gates every tile.
    p = pl.program_id(1)
    c = pl.program_id(2)
    Bt = x_ref.shape[0]
    inv_hw = 1.0 / HW

    @pl.when(p == 0)
    def _pool():
        pooled = jnp.sum(x_ref[...], axis=2, dtype=jnp.float32) * inv_hw   # (Bt, Ct)
        # Zero channels past C: they become the conv's zero padding and must
        # not contaminate valid neighbours (OOB block rows hold garbage).
        ch = c * Ct + lax.broadcasted_iota(jnp.int32, pooled.shape, 1)
        pooled_sc[c] = jnp.where(ch < C, pooled, 0.0)

    @pl.when(jnp.logical_and(p == 1, c == 0))
    def _attn():
        pooled = jnp.concatenate([pooled_sc[i] for i in range(C_blocks)], axis=1)
        attn = _channel_conv_sigmoid(pooled, w_ref, bn_ref, K, PAD)        # (Bt, C_blocks*Ct)
        for i in range(C_blocks):                                          # static loop
            attn_sc[i] = lax.slice(attn, (0, i * Ct), (Bt, (i + 1) * Ct))

    @pl.when(p == 1)
    def _gate():
        o_ref[...] = attn_sc[c].astype(o_ref.dtype)[..., None] * x_ref[...]


def eca_block(x, conv_w, bn_scale_shift, *, force_channel_tile=None):
    """ECA forward.  x: (B, C, H, W); conv_w: Conv1d(1,1,K) weight (any shape
    ending in K); bn_scale_shift: [scale, shift] = eval-mode BatchNorm1d folded
    into an affine."""
    B, C, H, W = x.shape
    HW = H * W
    K = int(conv_w.shape[-1])
    PAD = (K - 1) // 2

    x3 = x.reshape(B, C, HW)                             # metadata-only reshape
    w1 = jnp.asarray(conv_w).reshape(K).astype(jnp.float32)
    bn = jnp.asarray(bn_scale_shift).reshape(2).astype(jnp.float32)

    itemsize = jnp.dtype(x.dtype).itemsize
    row_bytes = C * HW * itemsize                        # one batch row (C, HW)

    # Hardware-aware budgets (v7x: 64 MiB VMEM, v5e/v6e: 128 MiB).
    try:
        vmem_phys = int(getattr(pltpu.get_tpu_info(), "vmem_capacity_bytes", 64 << 20))
    except Exception:
        vmem_phys = 64 << 20                             # conservative (v7x)
    vmem_cap = (vmem_phys * 3) // 4                      # headroom for DMA windows etc.
    block_target = max(2 << 20, vmem_phys // 16)         # ~4 MiB v7x / ~8 MiB v5e/v6e

    smem_specs = [pl.BlockSpec(memory_space=pltpu.MemorySpace.SMEM),
                  pl.BlockSpec(memory_space=pltpu.MemorySpace.SMEM)]

    use_tiled = (force_channel_tile is not None
                 or 4 * row_bytes > vmem_cap - (4 << 20))

    if not use_tiled:
        # ---- fused single-pass path: grid over (possibly partial) batch blocks
        max_bt_mem = max(1, (vmem_cap - (4 << 20)) // (4 * row_bytes))
        bt = max(1, min(B, max(1, block_target // row_bytes), max_bt_mem))
        if B >= 2:
            bt = min(bt, _cdiv(B, 2))   # >= 2 grid steps: pipeline fill + megacore
        steps = _cdiv(B, bt)            # cdiv grid: awkward B handled by masked tail
        # TODO(synk): for B == 1 a single grid step leaves one v7x TensorCore
        # idle and gives no DMA/compute overlap; a split pooling/gating pass
        # would be needed to do better for that case.
        vmem_limit = int(min(vmem_cap, max(32 << 20, 4 * bt * row_bytes + (4 << 20))))
        kern = functools.partial(_eca_fused_kernel, K=K, PAD=PAD, HW=HW)
        out = pl.pallas_call(
            kern,
            out_shape=jax.ShapeDtypeStruct((B, C, HW), x.dtype),
            grid=(steps,),
            in_specs=[pl.BlockSpec((bt, C, HW), lambda b: (b, 0, 0))] + smem_specs,
            out_specs=pl.BlockSpec((bt, C, HW), lambda b: (b, 0, 0)),
            compiler_params=pltpu.CompilerParams(
                dimension_semantics=("parallel",),
                vmem_limit_bytes=vmem_limit,
            ),
        )(x3, w1, bn)
    else:
        # ---- channel-tiled two-phase path (large (C, HW) rows) ----
        sub = max(8, 32 // itemsize)                     # sublane tile: 8 f32 / 16 bf16
        c_pad_max = _cdiv(C, sub) * sub
        ct_mem = max(1, (vmem_cap - (4 << 20)) // (4 * HW * itemsize))
        ct_target = max(1, block_target // (HW * itemsize))
        ct = min(ct_target, ct_mem, c_pad_max)
        if force_channel_tile is not None:
            ct = min(int(force_channel_tile), c_pad_max)
        ct = max(sub, (ct // sub) * sub)
        c_blocks = _cdiv(C, ct)
        # TODO(synk): if even a (1, sub, HW) block overflows VMEM (extremely
        # large H*W), an additional spatial tiling of the gate phase is needed.
        block_bytes = ct * HW * itemsize
        vmem_limit = int(min(vmem_cap, max(32 << 20, 4 * block_bytes + (4 << 20))))
        kern = functools.partial(_eca_tiled_kernel, K=K, PAD=PAD, HW=HW,
                                 C=C, Ct=ct, C_blocks=c_blocks)
        out = pl.pallas_call(
            kern,
            out_shape=jax.ShapeDtypeStruct((B, C, HW), x.dtype),
            grid=(B, 2, c_blocks),
            in_specs=[pl.BlockSpec((1, ct, HW), lambda b, p, c: (b, c, 0))] + smem_specs,
            # Phase 0 parks the (unwritten) output window on tile 0 so nothing
            # is written back until phase 1 produces each gated tile.
            out_specs=pl.BlockSpec((1, ct, HW), lambda b, p, c: (b, p * c, 0)),
            scratch_shapes=[pltpu.VMEM((c_blocks, 1, ct), jnp.float32),
                            pltpu.VMEM((c_blocks, 1, ct), jnp.float32)],
            compiler_params=pltpu.CompilerParams(
                dimension_semantics=("parallel", "arbitrary", "arbitrary"),
                vmem_limit_bytes=vmem_limit,
            ),
        )(x3, w1, bn)

    return out.reshape(B, C, H, W)


def _eca_reference(x, conv_w, scale, shift):
    """Pure-JAX reference matching the PyTorch module in eval mode."""
    B, C, H, W = x.shape
    K = conv_w.shape[-1]
    PAD = (K - 1) // 2
    w = jnp.asarray(conv_w, jnp.float32).reshape(K)
    pooled = jnp.mean(x.astype(jnp.float32), axis=(2, 3))            # (B, C)
    padded = jnp.pad(pooled, ((0, 0), (PAD, PAD)))
    conv = sum(w[j] * padded[:, j:j + C] for j in range(K))
    attn = jax.nn.sigmoid(conv * scale + shift)
    return (attn[:, :, None, None] * x.astype(jnp.float32)).astype(x.dtype)


if __name__ == "__main__":
    key = jax.random.PRNGKey(0)

    # BatchNorm1d(1) eval-mode defaults: gamma=1, beta=0, mean=0, var=1.
    gamma, beta, r_mean, r_var, eps = 1.0, 0.0, 0.0, 1.0, 1e-5
    scale = gamma / math.sqrt(r_var + eps)
    shift = beta - r_mean * scale
    bn = jnp.array([scale, shift], dtype=jnp.float32)

    def run_case(B, C, H, W, kkey, force_channel_tile=None):
        kx, kw = jax.random.split(kkey)
        x = jax.random.normal(kx, (B, C, H, W), dtype=jnp.float32)
        K = _eca_kernel_size(C)
        conv_w = jax.random.normal(kw, (1, 1, K), dtype=jnp.float32) * 0.1
        out = eca_block(x, conv_w, bn, force_channel_tile=force_channel_tile)
        jax.block_until_ready(out)
        ref = _eca_reference(x, conv_w, scale, shift)
        assert out.shape == x.shape
        assert jnp.allclose(out, ref, atol=1e-5, rtol=1e-5), \
            f"mismatch vs reference for shape {(B, C, H, W)}"

    k1, k2, k3 = jax.random.split(key, 3)
    # Fused path, lane-aligned spatial size.
    run_case(2, 8, 16, 16, k1)
    # Fused path, ragged spatial tail (HW % 128 != 0) + partial (cdiv) batch block.
    run_case(3, 8, 9, 9, k2)
    # Channel-tiled two-phase path (forced), conv halo crossing a tile boundary.
    run_case(2, 16, 9, 9, k3, force_channel_tile=8)

    print("KERNEL_OK")
</pallas_src>

<mosaic_0001>
module attributes {stable_mosaic.version = 11 : i64} {
  func.func @_eca_fused_kernel(%arg0: i32, %arg1: memref<1x8x256xf32, #tpu.memory_space<vmem>>, %arg2: memref<3xf32, #tpu.memory_space<smem>>, %arg3: memref<2xf32, #tpu.memory_space<smem>>, %arg4: memref<1x8x256xf32, #tpu.memory_space<vmem>>) attributes {dimension_semantics = [#tpu.dimension_semantics<parallel>], iteration_bounds = array<i64: 2>, scalar_prefetch = 0 : i64, scratch_operands = 0 : i64, tpu.core_type = #tpu.core_type<tc>, window_params = [{transform_indices = @transform_0, window_bounds = array<i64: 1, 8, 256>}, {transform_indices = @transform_1, window_bounds = array<i64: 3>}, {transform_indices = @transform_2, window_bounds = array<i64: 2>}, {transform_indices = @transform_3, window_bounds = array<i64: 1, 8, 256>}]} {
    %c0 = arith.constant 0 : index
    %c0_0 = arith.constant 0 : index
    %c0_1 = arith.constant 0 : index
    %0 = vector.load %arg1[%c0, %c0_0, %c0_1] : memref<1x8x256xf32, #tpu.memory_space<vmem>>, vector<1x8x256xf32>
    %cst = arith.constant dense<0.000000e+00> : vector<1x8xf32>
    %1 = vector.multi_reduction <add>, %0, %cst [2] : vector<1x8x256xf32> to vector<1x8xf32>
    %cst_2 = arith.constant 3.906250e-03 : f32
    %2 = vector.broadcast %cst_2 : f32 to vector<1x8xf32>
    %3 = arith.mulf %1, %2 : vector<1x8xf32>
    %c0_i32 = arith.constant 0 : i32
    %4 = arith.sitofp %c0_i32 : i32 to f32
    %5 = vector.broadcast %4 : f32 to vector<1x1xf32>
    %6 = tpu.concatenate %5, %3 in 1 : vector<1x1xf32>, vector<1x8xf32> -> vector<1x9xf32>
    %7 = vector.broadcast %4 : f32 to vector<1x1xf32>
    %8 = tpu.concatenate %6, %7 in 1 : vector<1x9xf32>, vector<1x1xf32> -> vector<1x10xf32>
    %cst_3 = arith.constant 0.000000e+00 : f32
    %9 = vector.broadcast %cst_3 : f32 to vector<1x8xf32>
    %c0_4 = arith.constant 0 : index
    %10 = memref.load %arg2[%c0_4] : memref<3xf32, #tpu.memory_space<smem>>
    %11 = vector.extract_strided_slice %8 {offsets = [0, 0], sizes = [1, 8], strides = [1, 1]} : vector<1x10xf32> to vector<1x8xf32>
    %12 = vector.broadcast %10 : f32 to vector<1x8xf32>
    %13 = arith.mulf %12, %11 : vector<1x8xf32>
    %14 = arith.addf %9, %13 : vector<1x8xf32>
    %c1 = arith.constant 1 : index
    %15 = memref.load %arg2[%c1] : memref<3xf32, #tpu.memory_space<smem>>
    %16 = vector.extract_strided_slice %8 {offsets = [0, 1], sizes = [1, 8], strides = [1, 1]} : vector<1x10xf32> to vector<1x8xf32>
    %17 = vector.broadcast %15 : f32 to vector<1x8xf32>
    %18 = arith.mulf %17, %16 : vector<1x8xf32>
    %19 = arith.addf %14, %18 : vector<1x8xf32>
    %c2 = arith.constant 2 : index
    %20 = memref.load %arg2[%c2] : memref<3xf32, #tpu.memory_space<smem>>
    %21 = vector.extract_strided_slice %8 {offsets = [0, 2], sizes = [1, 8], strides = [1, 1]} : vector<1x10xf32> to vector<1x8xf32>
    %22 = vector.broadcast %20 : f32 to vector<1x8xf32>
    %23 = arith.mulf %22, %21 : vector<1x8xf32>
    %24 = arith.addf %19, %23 : vector<1x8xf32>
    %c0_5 = arith.constant 0 : index
    %25 = memref.load %arg3[%c0_5] : memref<2xf32, #tpu.memory_space<smem>>
    %26 = vector.broadcast %25 : f32 to vector<1x8xf32>
    %27 = arith.mulf %24, %26 : vector<1x8xf32>
    %c1_6 = arith.constant 1 : index
    %28 = memref.load %arg3[%c1_6] : memref<2xf32, #tpu.memory_space<smem>>
    %29 = vector.broadcast %28 : f32 to vector<1x8xf32>
    %30 = arith.addf %27, %29 : vector<1x8xf32>
    %31 = arith.negf %30 : vector<1x8xf32>
    %32 = math.exp %31 : vector<1x8xf32>
    %cst_7 = arith.constant 1.000000e+00 : f32
    %33 = vector.broadcast %cst_7 : f32 to vector<1x8xf32>
    %34 = arith.addf %33, %32 : vector<1x8xf32>
    %35 = arith.divf %33, %34 : vector<1x8xf32>
    %36 = vector.shape_cast %35 : vector<1x8xf32> to vector<1x8x1xf32>
    %c0_8 = arith.constant 0 : index
    %c0_9 = arith.constant 0 : index
    %c0_10 = arith.constant 0 : index
    %37 = vector.load %arg1[%c0_8, %c0_9, %c0_10] : memref<1x8x256xf32, #tpu.memory_space<vmem>>, vector<1x8x256xf32>
    %38 = vector.broadcast %36 : vector<1x8x1xf32> to vector<1x8x256xf32>
    %39 = arith.mulf %38, %37 : vector<1x8x256xf32>
    %c0_11 = arith.constant 0 : index
    %c0_12 = arith.constant 0 : index
    %c0_13 = arith.constant 0 : index
    %40 = vector.load %arg4[%c0_11, %c0_12, %c0_13] : memref<1x8x256xf32, #tpu.memory_space<vmem>>, vector<1x8x256xf32>
    tpu.vector_store %arg4[%c0_11, %c0_12, %c0_13], %39 {strides = array<i32>} : memref<1x8x256xf32, #tpu.memory_space<vmem>>, vector<1x8x256xf32>,
    return
  }
  func.func @transform_0(%arg0: i32) -> (i32, i32, i32) {
    %c0_i32 = arith.constant 0 : i32
    %c0_i32_0 = arith.constant 0 : i32
    %c0_i32_1 = arith.constant 0 : i32
    return %arg0, %c0_i32, %c0_i32_0 : i32, i32, i32
  }
  func.func @transform_1(%arg0: i32) -> i32 {
    %c0_i32 = arith.constant 0 : i32
    %c0_i32_0 = arith.constant 0 : i32
    return %c0_i32 : i32
  }
  func.func @transform_2(%arg0: i32) -> i32 {
    %c0_i32 = arith.constant 0 : i32
    %c0_i32_0 = arith.constant 0 : i32
    return %c0_i32 : i32
  }
  func.func @transform_3(%arg0: i32) -> (i32, i32, i32) {
    %c0_i32 = arith.constant 0 : i32
    %c0_i32_0 = arith.constant 0 : i32
    %c0_i32_1 = arith.constant 0 : i32
    return %arg0, %c0_i32, %c0_i32_0 : i32, i32, i32
  }
}

</mosaic_0001>

<bundles_post_ra>
// kernel: tpu_custom_call.1
= control target key start
LH: loop header
LB: loop body
LE: loop exit
PB: predicated region body
PF: predicated region fallthrough
CT: control target
= control target key end

     0   :  { %8 = vsyncpa [#allocation3], 0  ;;  %s811_s0 = inlined_call_operand.hbm [shape: f32[2,8,256], index: 0, kind: input, shape index: {}]   ;;  %s812_s1 = inlined_call_operand.vmem [shape: f32[3], index: 1, kind: input, shape index: {}]   ;;  %s813_s2 = inlined_call_operand.vmem [shape: f32[2], index: 2, kind: input, shape index: {}]   ;;  %s814_s3 = inlined_call_operand.hbm [shape: f32[2,8,256], index: 3, kind: output, shape index: {}]  }
   0x1   :  { %10 = vsyncpa [#allocation3 + $0x1], 0 }
   0x2   :  { %11 = vsyncpa [#allocation5], 0 }
   0x3   :  { %12 = vsyncpa [#allocation8], 0 }
   0x4   :  { %13 = vsyncpa [#allocation4], 0 }
   0x5   :  { %15 = vsyncpa [#allocation4 + $0x1], 0  ;;  %s638_s12 = smov 0   ;;  %s640_s13 = smov 0  }
   0x6   :  { %s642_s14 = smov 0   ;;  %s644_s15 = smov 0  }
   0x7 LB: > { %s659_s16 = sadd.s32 4294967295, %s610_s15   ;;  %s383_s17 = sadd.s32 4294967294, %s610_s15   ;;  %s610_s15 = sphi %s644_s15, %s838_s15   ;;  %s606_s14 = sphi %s642_s14, %s837_s14   ;;  %s602_s13 = sphi %s640_s13, %s836_s13   ;;  %s598_s12 = sphi %s638_s12, %s835_s12  }
   0x8   : > { %p41_p0 = scmp.ne.s32.totalorder %s602_s13, %s598_s12  ;;  %p815_p1 = scmp.eq.s32.totalorder %s659_s16, 0 }
   0x9   : > { %p113_p3 = scmp.eq.s32.totalorder %s383_s17, 1  ;;  %p384_p5 = scmp.ge.s32.totalorder %s610_s15, 1 }
   0xa   : > { %p668_p4 = por %p815_p1, %p41_p0  ;;  %p120_p7 = scmp.lt.s32.totalorder %s610_s15, 3 }
   0xb   : > { %p673_p6 = por %p113_p3, %p41_p0  ;;  %s133_s22 = sshll.u32 %s812_s1, 4  ;;  %s134_s22 = int_to_ptr.vmem [resolvable:$true] %s133_s22 }
   0xc   : > { %s819_s18 = scalar_select %p668_p4, 1, 0 }
   0xd   : > { %s820_s19 = scalar_select %p673_p6, 1, 0 }
   0xe   : > { %p681_p8 = pnand %p384_p5, %p120_p7  ;;  %s144_s26 = sshll.u32 %s813_s2, 4  ;;  %s145_s26 = int_to_ptr.vmem [resolvable:$true] %s144_s26 }
   0xf   : > { %s698_s28 = sadd.s32 1, %s610_s15   ;;  %s480_s30 = scalar_lea.vmem %s134_s22, 16 }
  0x10   : > { %s821_s23 = scalar_select %p681_p8, 1, 0 }
  0x11   : > { %p419_p10 = pneg %p681_p8  ;;  %s25_s29 = ssub.s32 %s610_s15, %s698_s28 }
  0x12   : > { %p481_p12 = scmp.ne.s32.totalorder %s134_s22, %s480_s30  ;;  %p488_p5 = scmp.lt.s32.totalorder %s134_s22, %s134_s22 }
  0x13   : > { %p693_p11 = pnand %p419_p10, %p815_p1  ;;  %p489_p7 = scmp.lt.s32.totalorder %s480_s30, %s480_s30 }
  0x15   : > { %p482_p13 = pneg %p693_p11  ;;  %p490_p9 = por %p489_p7, %p488_p5 }
  0x17   : > { %p483_p0 = pnand %p482_p13, %p481_p12 }
  0x19   : > { %p484_p3 = pneg %p483_p0 }
  0x1b   : > { %p491_p2 = pnand %p490_p9, %p484_p3 }
  0x1d   : > { %494 = shalt.err (!%p491_p2)
}
  0x1e   : > { %s612_s4 = smov [#allocation6]   ;;  %s495_s5 = scalar_lea.vmem %s145_s26, 16 }
  0x1f   : > { %422 = dma.vmem_to_smem (!%p693_p11), %s134_s22, 16, %s612_s4, [#allocation5]  }
  0x20   : > { %p496_p10 = scmp.ne.s32.totalorder %s145_s26, %s495_s5  ;;  %p503_p4 = scmp.lt.s32.totalorder %s145_s26, %s145_s26 }
  0x21   : > { %p504_p8 = scmp.lt.s32.totalorder %s495_s5, %s495_s5 }
  0x22   : > { %p498_p1 = pnand %p496_p10, %p482_p13 }
  0x23   : > { %p505_p12 = por %p504_p8, %p503_p4 }
  0x24   : > { %p499_p6 = pneg %p498_p1 }
  0x26   : > { %p506_p0 = pnand %p505_p12, %p499_p6 }
  0x28   : > { %509 = shalt.err (!%p506_p0)
}
  0x29   : > { %s613_s6 = smov [#allocation7]   ;;  %p26_p2 = scmp.eq.s32.totalorder %s25_s29, 0 }
  0x2a   : > { %425 = dma.vmem_to_smem (!%p693_p11), %s145_s26, 16, %s613_s6, [#allocation8]  }
  0x2b   : > { %s28_s7 = sadd.s32 1, %s606_s14  ;;  %p35_p1 = scmp.ne.s32.totalorder %s606_s14, %s602_s13 }
  0x2c   : > { %p36_p9 = scmp.eq.s32.totalorder %s610_s15, 0  ;;  %p823_p6 = scmp.eq.s32.totalorder %s659_s16, 1 }
  0x2d   : > { %s713_s8 = scalar_select %p26_p2, %s606_s14, %s28_s7  }
  0x2e   : > { %p37_p4 = por %p36_p9, %p35_p1  ;;  %p717_p8 = por %p823_p6, %p35_p1 }
  0x2f   : > { %p436_p13 = scmp.lt.s32.totalorder %s610_s15, 2  ;;  %s155_s10 = sand.u32 1, %s606_s14  }
  0x30   : > { %s824_s9 = scalar_select %p717_p8, 1, 0 }
  0x31   : > { %s388_s11 = sshll.u32 %s155_s10, 4  ;;  %s405_s17 = sshll.u32 %s610_s15, 8 }
  0x32   : > { %s727_s22 = scalar_lea.hbm %s811_s0, %s405_s17  ;;  %s159_s24 = scalar_lea.vmem [#allocation2], %s388_s11 }
  0x33   : > { %s167_s25 = sshll.u32 %s159_s24, 4  ;;  %p729_p11 = pnand %p436_p13, %p37_p4  ;;  %s168_s25 = int_to_ptr.vmem [resolvable:$true] %s167_s25 }
  0x34   : > { %s156_s27 = scalar_lea.sflag [#allocation3], %s155_s10  ;;  %s510_s29 = scalar_lea.hbm %s727_s22, 256 }
  0x35   : > { %p511_p3 = scmp.ne.s32.totalorder %s727_s22, %s510_s29  ;;  %p512_p5 = pneg %p729_p11 }
  0x36   : > { %s515_s5 = scalar_lea.hbm %s811_s0, 512  ;;  %p516_p12 = scmp.lt.s32.totalorder %s727_s22, %s811_s0 }
  0x37   : > { %p513_p7 = pnand %p512_p5, %p511_p3  ;;  %p517_p0 = scmp.lt.s32.totalorder %s515_s5, %s510_s29 }
  0x39   : > { %p514_p10 = pneg %p513_p7  ;;  %p518_p2 = por %p517_p0, %p516_p12 }
  0x3b   : > { %p519_p1 = pnand %p518_p2, %p514_p10 }
  0x3d   : > { %522 = shalt.err (!%p519_p1)
}
  0x3e   : > { %s523_s11 = scalar_lea.vmem %s168_s25, 256  ;;  %s614_s10 = smov [#allocation2]  }
  0x3f   : > { %p524_p9 = scmp.ne.s32.totalorder %s168_s25, %s523_s11  ;;  %s528_s17 = sshll.u32 %s614_s10, 4  ;;  %s529_s17 = int_to_ptr.vmem [resolvable:$false] %s528_s17 }
  0x40   : > { %s530_s20 = scalar_lea.vmem %s529_s17, 512  ;;  %p531_p13 = scmp.lt.s32.totalorder %s168_s25, %s529_s17 }
  0x41   : > { %p526_p4 = pnand %p524_p9, %p512_p5  ;;  %p532_p3 = scmp.lt.s32.totalorder %s530_s20, %s523_s11 }
  0x43   : > { %p527_p6 = pneg %p526_p4  ;;  %p533_p7 = por %p532_p3, %p531_p13 }
  0x45   : > { %p534_p8 = pnand %p533_p7, %p527_p6 }
  0x47   : > { %537 = shalt.err (!%p534_p8)
}
  0x48   : > { %429 = dma.hbm_to_vmem [thread:$0]  (!%p729_p11), %s727_s22, 256, %s168_s25, %s156_s27  }
  0x49   : > { %p826_p10 = scmp.ne.s32.totalorder %s821_s23, 0 }
  0x4a   : > { %s750_s21 = sand.u32 (!%p826_p10), 1, %s602_s13   ;;  %p827_p5 = scmp.ne.s32.totalorder (!%p826_p10), %s819_s18, 0 }
  0x4b   : > { %176 = sbr.rel (%p826_p10) target bundleno = 526 (0x20e), region = 32  ;;  %s392_s24 = sshll.u32 (!%p826_p10), %s750_s21, 4 }
  0x4c   : > { %s179_s29 = scalar_lea.sflag (!%p826_p10), [#allocation3], %s750_s21  ;;  %s182_s30 = scalar_lea.vmem (!%p826_p10), [#allocation2], %s392_s24 }
  0x50   : > { %581 = dma.done.wait (%p827_p5), %s179_s29, 256  }
  0x51   : > { %583 = vsyncadd (%p827_p5), %s179_s29, 4294967040  ;;  %p828_p8 = scmp.eq.s32.totalorder %s659_s16, 0 }
  0x53   : > { %585 = dma.done.wait (%p828_p8), [#allocation5], 16   ;;  %p829_p11 = pmov %p828_p8 }
  0x54   : > { %p830_p12 = pmov %p828_p8 }
  0x55   : > { %587 = vsyncadd (%p829_p11), [#allocation5], 4294967280 }
  0x56   : > { %589 = dma.done.wait (%p830_p12), [#allocation8], 16   ;;  %p831_p0 = pmov %p828_p8 }
  0x58   : > { %591 = vsyncadd (%p831_p0), [#allocation8], 4294967280 }
  0x59   : > { %195 = sfence }
  0x5a   : > { %v214_v0 = vld [vmem:[%s182_s30] sm:$0xff]  ;;  %v215_v1 = vld [vmem:[%s182_s30 + $0x8] sm:$0xff]  ;;  %v221_v3 = vlaneseq  ;;  %s397_s18 = sld [smem:[#allocation6 + $0x2]]  ;;  %vm229_vm0 = vcmask 7168   ;;  %vm231_vm1 = vcmask 72704   ;;  %s615_s22 = smov 126  }
  0x5b   : > { %v216_v2 = vadd.f32 %v215_v1, %v214_v0  ;;  %s396_s23 = sld [smem:[#allocation6 + $0x1]]  ;;  %s616_s25 = smov 127  }
  0x5c   : > { %v222_v4 = vand.u32 127, %v221_v3  ;;  %v225_v6 = vshrl.u32 %v221_v3, 7  ;;  %s233_s26 = sld [smem:[#allocation6]]  ;;  %s406_s5 = sshll.u32 %s659_s16, 8 }
  0x5d   : > { %217 = vadd.xlane.f32.xlu0 %v216_v2  ;;  %s253_s27 = sld [smem:[#allocation7]]  ;;  %s213_s6 = scalar_lea.vmem [#allocation9], %s392_s24 }
  0x5e   : > { %v223_v5 = vadd.s32 4294967295, %v222_v4  ;;  %s398_s4 = sld [smem:[#allocation7 + $0x1]]  ;;  %v267_v30 = vsub.s32 0, %v225_v6  ;;  %s291_s7 = sshll.u32 %s213_s6, 4  ;;  %s292_s7 = int_to_ptr.vmem [resolvable:$true] %s291_s7 }
  0x5f   : > { %s774_s17 = scalar_lea.hbm %s814_s3, %s406_s5  ;;  %s277_s20 = scalar_lea.sflag [#allocation4], %s750_s21 }
  0x60   : > { %v226_v7 = vsub.s32 %v223_v5, %v225_v6  ;;  %v246_v11 = vstv %s397_s18  ;;  %s538_s29 = scalar_lea.vmem %s292_s7, 256  ;;  %p832_p1 = scmp.ne.s32.totalorder %s824_s9, 0 }
  0x61   : > { %v238_v12 = vstv %s396_s23  ;;  %p539_p2 = scmp.ne.s32.totalorder %s292_s7, %s538_s29  ;;  %s617_s16 = smov [#allocation9]  }
  0x62   : > { %v234_v17 = vstv %s233_s26  ;;  %s542_s24 = sshll.u32 %s617_s16, 4  ;;  %s543_s24 = int_to_ptr.vmem [resolvable:$false] %s542_s24 }
  0x63   : > { %v254_v22 = vstv %s253_s27  ;;  %p540_p9 = pnand %p539_p2, %p832_p1  ;;  %s544_s30 = scalar_lea.vmem %s543_s24, 512 }
  0x64   : > { %v257_v24 = vstv %s398_s4  ;;  %p545_p6 = scmp.lt.s32.totalorder %s292_s7, %s543_s24  ;;  %p546_p13 = scmp.lt.s32.totalorder %s544_s30, %s538_s29 }
  0x65   : > { %p541_p4 = pneg %p540_p9 }
  0x66   : > { %p547_p3 = por %p546_p13, %p545_p6 }
  0x68   : > { %p548_p7 = pnand %p547_p3, %p541_p4 }
  0xe6   : > { %v218_v8 = vpop.xlane.xlu0 %217 }
  0xe7   : > { %v219_v9 = vmul.f32 0.00390625, %v218_v8 }
  0xe9   : > { %v227_v10 = vrot.slane %v219_v9, %v226_v7 }
  0xeb   : > { %v230_v13 = vsel %vm229_vm0, 0.0, %v227_v10 }
  0xec   : > { %v232_v14 = vsel %vm231_vm1, %v230_v13, 0.0 }
  0xed   : > { %v247_v15 = vmul.f32 %v246_v11, %v232_v14  ;;  %v239_v16 = vmul.f32 %v238_v12, %v232_v14  ;;  %v235_v18 = vmul.f32 %v234_v17, %v232_v14 }
  0xef   : > { %249 = vrot.lane.b32.xlu1 %v247_v15, %s615_s22  ;;  %241 = vrot.lane.b32.xlu0 %v239_v16, %s616_s25 }
 0x161   : > { %v242_v19 = vpop.permute.xlu0 %241  ;;  %v250_v21 = vpop.permute.xlu1 %249 }
 0x162   : > { %v244_v20 = vadd.f32 %v242_v19, %v235_v18 }
 0x164   : > { %v252_v23 = vadd.f32 %v250_v21, %v244_v20 }
 0x166   : > { %v255_v25 = vmul.f32 %v254_v22, %v252_v23 }
 0x168   : > { %v258_v26 = vadd.f32 %v257_v24, %v255_v25 }
 0x16a   : > { %v399_v27 = vmul.f32 -1.442695, %v258_v26 }
 0x16c   : > { %476 = vpow2.f32 %v399_v27 }
 0x179   : > { %v477_v28 = vpop.eup %476 }
 0x17a   : > { %v262_v29 = vadd.f32 1.0, %v477_v28 }
 0x17c   : > { %478 = vrcp.f32 %v262_v29 }
 0x189   : > { %v479_v31 = vpop.eup %478 }
 0x18a   : > { %v268_v32 = vrot.slane %v479_v31, %v267_v30 }
 0x18c   : > { %270 = vbcast.lane.b32.xlu1 %v268_v32, 256 }
 0x1fe   : > { %v271_v33 = vpop.permute.xlu1 %270 }
 0x1ff   : > { %v272_v34 = vmul.f32 %v271_v33, %v214_v0  ;;  %v273_v35 = vmul.f32 %v271_v33, %v215_v1 }
 0x201   : > { %274 = vst [vmem:[%s213_s6] sm:$0xff] %v272_v34  ;;  %275 = vst [vmem:[%s213_s6 + $0x8] sm:$0xff] %v273_v35 }
 0x202   : > { %551 = shalt.err (!%p548_p7)
}
 0x203   : > { %s552_s18 = scalar_lea.hbm %s774_s17, 256  ;;  %s556_s22 = scalar_lea.hbm %s814_s3, 512 }
 0x204   : > { %p553_p10 = scmp.ne.s32.totalorder %s774_s17, %s552_s18  ;;  %p557_p11 = scmp.lt.s32.totalorder %s774_s17, %s814_s3 }
 0x205   : > { %p558_p12 = scmp.lt.s32.totalorder %s556_s22, %s552_s18 }
 0x206   : > { %p554_p5 = pnand %p553_p10, %p832_p1 }
 0x207   : > { %p559_p0 = por %p558_p12, %p557_p11 }
 0x208   : > { %p555_p8 = pneg %p554_p5 }
 0x20a   : > { %p560_p2 = pnand %p559_p0, %p555_p8 }
 0x20c   : > { %563 = shalt.err (!%p560_p2)
}
 0x20d   : > { %417 = dma.vmem_to_hbm [thread:$0]  (%p832_p1), %s292_s7, 256, %s774_s17, %s277_s20  }
 0x20e PF: > { %s303_s27 = sand.u32 1, %s598_s12   ;;  %p833_p9 = scmp.ne.s32.totalorder %s820_s19, 0 }
 0x20f   : > { %p834_p4 = scmp.ge.s32.totalorder %s610_s15, 2  ;;  %s304_s4 = scalar_lea.sflag [#allocation4], %s303_s27 }
 0x211   : > { %p431_p6 = pnand %p834_p4, %p833_p9 }
 0x213   : > { %p432_p13 = pneg %p431_p6 }
 0x215   : > { %593 = dma.done.wait (%p432_p13), %s304_s4, 256  }
 0x216   : > { %595 = vsyncadd (%p432_p13), %s304_s4, 4294967040  ;;  %p18_p3 = scmp.ge.s32.totalorder %s698_s28, 4   ;;  %s835_s12 = smov %s602_s13 }
 0x217   : > { %s836_s13 = smov %s606_s14  ;;  %s837_s14 = smov %s713_s8 }
 0x218   : > { %s838_s15 = smov %s698_s28  ;;  %20 = sbr.rel (!%p18_p3) target bundleno = 7 (0x7), region = 86 }
 0x21d   :  { %309 = vsyncpa [#allocation3], 1 }
 0x21e   :  { %311 = vsyncpa [#allocation3 + $0x1], 1 }
 0x21f   :  { %312 = vsyncpa [#allocation4], 1 }
 0x220   :  { %314 = vsyncpa [#allocation4 + $0x1], 1 }
 0x221   :  { %315 = vsyncpa [#allocation5], 1 }
 0x222   :  { %317 = vsyncpa [#allocation5 + $0x1], 1 }
 0x223   :  { %318 = vsyncpa [#allocation8], 1 }

</bundles_post_ra>
